<compile_context>
chip_gen: v7x
topology: tpu7x:2x2x1
jax: 0.10.0
libtpu: 0.0.40
codegen_flags: <defaults>
</compile_context>

<pallas_src>
import jax
import jax.numpy as jnp
from jax import lax
from jax.experimental import pallas as pl
from jax.experimental.pallas import tpu as pltpu


# ------------------------------ 1x1 conv kernel ------------------------------
def _conv1x1_kernel(x_ref, w_ref, b_ref, o_ref):
    # x_ref: (Nb, Cin, T)   Nb batch samples, spatial tile T on the lane axis
    # w_ref: (Cout, Cin)    resident across the whole grid (constant index_map)
    # b_ref: (Cout, 1)      bias, broadcast over the lane axis
    # o_ref: (Nb, Cout, T)  lane-dense output tile
    w = w_ref[...]
    bias = b_ref[...].astype(jnp.float32)
    # Static unroll over the (small) per-step batch; each iteration is one MXU matmul.
    # Note: for Cin,Cout <= 8 a VPU FMA path would shave per-step latency, but the kernel
    # is HBM-bound so the MXU path is kept for simplicity/robustness.
    for b in range(x_ref.shape[0]):
        acc = jnp.dot(w, x_ref[b], preferred_element_type=jnp.float32)
        o_ref[b] = (acc + bias).astype(o_ref.dtype)


# ------------------------------ tiling heuristics ------------------------------
def _round_down_128(x):
    return (x // 128) * 128


def _largest_divisor_at_most(n, cap):
    cap = max(1, min(n, int(cap)))
    for d in range(cap, 0, -1):
        if n % d == 0:
            return d
    return 1


def _choose_tiles(N, Cin, Cout, HW, dtype_bytes,
                  target_x_block_bytes=4 << 20,     # ~4 MiB x block per grid step
                  vmem_budget_bytes=24 << 20):      # double-buffered in+out blocks budget
    # --- spatial tile T (lane axis), Cin-aware: x block ~= target_x_block_bytes ---
    per_col_bytes = max(1, Cin * dtype_bytes)
    t_target = _round_down_128(target_x_block_bytes // per_col_bytes)
    if t_target >= HW or HW < 128:
        T = HW                                      # whole image per step (full-dim block)
    else:
        T = max(128, t_target)                      # multiple of 128; ragged last block OK

    # --- batch samples per step (amortize per-step overhead when HW is small) ---
    per_sample_bytes = max(1, Cin * T * dtype_bytes)
    nb_cap = max(1, target_x_block_bytes // per_sample_bytes)
    spatial_steps = -(-HW // T)
    if spatial_steps == 1 and N >= 2:
        # keep >=2 grid steps so both TensorCores are used on v7x
        nb_cap = min(nb_cap, max(1, N // 2))
    Nb = _largest_divisor_at_most(N, nb_cap)

    # --- stay inside a conservative VMEM budget (2x buffered x + out blocks) ---
    def blocks_bytes(nb, t):
        return 2 * nb * (Cin + Cout) * t * dtype_bytes

    while blocks_bytes(Nb, T) > vmem_budget_bytes and Nb > 1:
        Nb = _largest_divisor_at_most(N, Nb // 2)
    while blocks_bytes(Nb, T) > vmem_budget_bytes and T >= 256:
        T = max(128, _round_down_128(T // 2))

    # --- single-sample, single-tile grids idle one v7x TC: split the spatial axis ---
    if N == 1 and T == HW and HW >= 256:
        T = max(128, _round_down_128((HW + 1) // 2))

    return Nb, T


# ------------------------------ wrapper ------------------------------
def out_conv(x_nchw, weight, bias):
    """y = Conv2d(x, weight, bias, kernel_size=1).  weight: (Cout, Cin, 1, 1), bias: (Cout,)."""
    N, Cin, H, W = x_nchw.shape
    Cout = weight.shape[0]
    HW = H * W
    dtype_bytes = jnp.dtype(x_nchw.dtype).itemsize

    Nb, T = _choose_tiles(N, Cin, Cout, HW, dtype_bytes)

    # Layout glue only: merge contiguous H,W dims; drop the 1x1 taps.
    x3 = x_nchw.reshape(N, Cin, HW)
    w2 = weight.reshape(Cout, Cin)
    b2 = bias.reshape(Cout, 1)

    grid = (N // Nb, pl.cdiv(HW, T))                # Nb divides N; spatial may be ragged
    y3 = pl.pallas_call(
        _conv1x1_kernel,
        out_shape=jax.ShapeDtypeStruct((N, Cout, HW), x_nchw.dtype),
        grid=grid,
        in_specs=[
            pl.BlockSpec((Nb, Cin, T), lambda n, s: (n, 0, s)),   # HW on lanes, Cin on sublanes
            pl.BlockSpec((Cout, Cin), lambda n, s: (0, 0)),       # weight resident across grid
            pl.BlockSpec((Cout, 1), lambda n, s: (0, 0)),         # bias resident across grid
        ],
        out_specs=pl.BlockSpec((Nb, Cout, T), lambda n, s: (n, 0, s)),
        compiler_params=pltpu.CompilerParams(
            dimension_semantics=("parallel", "parallel"),         # shards across TCs on v7x
            vmem_limit_bytes=32 << 20),                           # above v5e's 16 MiB default,
                                                                  # safely under v7x's 64 MiB cap
    )(x3, w2, b2)
    return y3.reshape(N, Cout, H, W)


# --------------------------- pure-JAX reference ---------------------------
def reference_forward(x_nchw, weight, bias):
    y = lax.conv_general_dilated(
        x_nchw, weight, window_strides=(1, 1), padding="VALID",
        dimension_numbers=("NCHW", "OIHW", "NCHW"))
    return y + bias[None, :, None, None]


def init_params(key, in_channels, n_classes):
    k1, k2 = jax.random.split(key)
    bound = 1.0 / jnp.sqrt(float(in_channels))     # PyTorch Conv2d default init bound (k=1)
    weight = jax.random.uniform(k1, (n_classes, in_channels, 1, 1),
                                jnp.float32, -bound, bound)
    bias = jax.random.uniform(k2, (n_classes,), jnp.float32, -bound, bound)
    return weight, bias


if __name__ == "__main__":
    key = jax.random.PRNGKey(0)
    kx, kp = jax.random.split(key)

    batch, in_channels, n_classes, H, W = 2, 4, 3, 16, 16
    x = jax.random.normal(kx, (batch, in_channels, H, W), jnp.float32)   # NCHW, like PyTorch
    weight, bias = init_params(kp, in_channels, n_classes)

    out = jax.jit(out_conv)(x, weight, bias)
    out = jax.block_until_ready(out)

    ref = reference_forward(x, weight, bias)
    assert out.shape == (batch, n_classes, H, W), out.shape
    assert jnp.allclose(out, ref, rtol=1e-5, atol=1e-5), float(jnp.max(jnp.abs(out - ref)))

    print("KERNEL_OK")
</pallas_src>

<mosaic_0001>
module attributes {stable_mosaic.version = 11 : i64} {
  func.func @_conv1x1_kernel(%arg0: i32, %arg1: i32, %arg2: memref<1x4x256xf32, #tpu.memory_space<vmem>>, %arg3: memref<3x4xf32, #tpu.memory_space<vmem>>, %arg4: memref<3x1xf32, #tpu.memory_space<vmem>>, %arg5: memref<1x3x256xf32, #tpu.memory_space<vmem>>) attributes {dimension_semantics = [#tpu.dimension_semantics<parallel>, #tpu.dimension_semantics<parallel>], iteration_bounds = array<i64: 2, 1>, scalar_prefetch = 0 : i64, scratch_operands = 0 : i64, tpu.core_type = #tpu.core_type<tc>, window_params = [{transform_indices = @transform_0, window_bounds = array<i64: 1, 4, 256>}, {pipeline_mode = #tpu.pipeline_mode<synchronous>, transform_indices = @transform_1, window_bounds = array<i64: 3, 4>}, {pipeline_mode = #tpu.pipeline_mode<synchronous>, transform_indices = @transform_2, window_bounds = array<i64: 3, 1>}, {transform_indices = @transform_3, window_bounds = array<i64: 1, 3, 256>}]} {
    %c0 = arith.constant 0 : index
    %c0_0 = arith.constant 0 : index
    %0 = vector.load %arg3[%c0, %c0_0] : memref<3x4xf32, #tpu.memory_space<vmem>>, vector<3x4xf32>
    %c0_1 = arith.constant 0 : index
    %c0_2 = arith.constant 0 : index
    %1 = vector.load %arg4[%c0_1, %c0_2] : memref<3x1xf32, #tpu.memory_space<vmem>>, vector<3x1xf32>
    %c0_3 = arith.constant 0 : index
    %c0_4 = arith.constant 0 : index
    %c0_5 = arith.constant 0 : index
    %2 = vector.load %arg2[%c0_3, %c0_4, %c0_5] : memref<1x4x256xf32, #tpu.memory_space<vmem>>, vector<1x4x256xf32>
    %3 = vector.shape_cast %2 : vector<1x4x256xf32> to vector<4x256xf32>
    %cst = arith.constant dense<0.000000e+00> : vector<3x256xf32>
    %4 = tpu.matmul %0, %3, %cst {dimension_numbers = #tpu.dot_dimension_numbers<[1], [0], [0], [1], [0, 0, 1, 1], [], []>} : vector<3x4xf32>, vector<4x256xf32>, vector<3x256xf32> -> vector<3x256xf32>
    %5 = vector.broadcast %1 : vector<3x1xf32> to vector<3x256xf32>
    %6 = arith.addf %4, %5 : vector<3x256xf32>
    %c0_6 = arith.constant 0 : index
    %c0_7 = arith.constant 0 : index
    %c0_8 = arith.constant 0 : index
    %7 = vector.load %arg5[%c0_6, %c0_7, %c0_8] : memref<1x3x256xf32, #tpu.memory_space<vmem>>, vector<1x3x256xf32>
    %8 = vector.shape_cast %7 : vector<1x3x256xf32> to vector<3x256xf32>
    %9 = vector.shape_cast %6 : vector<3x256xf32> to vector<1x3x256xf32>
    tpu.vector_store %arg5[%c0_6, %c0_7, %c0_8], %9 {strides = array<i32>} : memref<1x3x256xf32, #tpu.memory_space<vmem>>, vector<1x3x256xf32>,
    return
  }
  func.func @transform_0(%arg0: i32, %arg1: i32) -> (i32, i32, i32) {
    %c0_i32 = arith.constant 0 : i32
    %c0_i32_0 = arith.constant 0 : i32
    return %arg0, %c0_i32, %arg1 : i32, i32, i32
  }
  func.func @transform_1(%arg0: i32, %arg1: i32) -> (i32, i32) {
    %c0_i32 = arith.constant 0 : i32
    %c0_i32_0 = arith.constant 0 : i32
    %c0_i32_1 = arith.constant 0 : i32
    return %c0_i32, %c0_i32_0 : i32, i32
  }
  func.func @transform_2(%arg0: i32, %arg1: i32) -> (i32, i32) {
    %c0_i32 = arith.constant 0 : i32
    %c0_i32_0 = arith.constant 0 : i32
    %c0_i32_1 = arith.constant 0 : i32
    return %c0_i32, %c0_i32_0 : i32, i32
  }
  func.func @transform_3(%arg0: i32, %arg1: i32) -> (i32, i32, i32) {
    %c0_i32 = arith.constant 0 : i32
    %c0_i32_0 = arith.constant 0 : i32
    return %arg0, %c0_i32, %arg1 : i32, i32, i32
  }
}

</mosaic_0001>

<bundles_post_ra>
// kernel: out_conv.1
= control target key start
LH: loop header
LB: loop body
LE: loop exit
PB: predicated region body
PF: predicated region fallthrough
CT: control target
= control target key end

     0   :  { %s482_s12 = smov 0   ;;  %s484_s13 = smov 0   ;;  %s521_s0 = inlined_call_operand.vmem [shape: f32[2,4,256], index: 0, kind: input, shape index: {}]   ;;  %s522_s1 = inlined_call_operand.vmem [shape: f32[3,4], index: 1, kind: input, shape index: {}]   ;;  %s523_s2 = inlined_call_operand.vmem [shape: f32[3,1], index: 2, kind: input, shape index: {}]   ;;  %s524_s3 = inlined_call_operand.vmem [shape: f32[2,3,256], index: 3, kind: output, shape index: {}]  }
   0x1   :  { %s486_s14 = smov 0  }
   0x2 LB: > { %s25_s15 = sadd.s32 1, %s454_s13  ;;  %p396_p0 = scmp.ge.s32.totalorder %s458_s14, 1  ;;  %s458_s14 = sphi %s486_s14, %s13_s14   ;;  %s454_s13 = sphi %s484_s13, %s526_s13   ;;  %s450_s12 = sphi %s482_s12, %s525_s12  }
   0x3   : > { %p27_p1 = scmp.ge.s32.totalorder %s25_s15, 2  ;;  %p158_p2 = scmp.lt.s32.totalorder %s458_s14, 3 }
   0x5   : > { %s528_s15 = smov (%p27_p1, %s25_s15), 0  ;;  %p159_p3 = pnand %p396_p0, %p158_p2 }
   0x6   : > { %p191_p4 = scmp.lt.s32.totalorder (!%p159_p3), %s450_s12, 1  ;;  %v460_v0 = vmov (!%p159_p3), 0.0   ;;  %v211_v1 = vld [vmem:[%s523_s2] sm:$0x7] (!%p159_p3)  ;;  %v461_v2 = vmov (!%p159_p3), 0   ;;  %vm224_vm0 = vcmask (!%p159_p3), 1043456  }
   0x7   : > { %162 = sbr.rel (%p159_p3) target bundleno = 240 (0xf0), region = 32  ;;  %293 = vmatprep.mubr.f32.mxu0 (!%p159_p3), %v460_v0  ;;  %434 = vset.pattern.permute.xlu0 (!%p159_p3), %v461_v2  ;;  %v210_v5 = vld [vmem:[%s522_s1] sm:$0x7] (!%p159_p3)  ;;  %vm220_vm1 = vcmask (!%p159_p3), 31744  }
   0x8   : > { %215 = vperm.xlu0 (!%p159_p3), %434, %v211_v1  }
   0xe   : > { %s530_s12 = smov (!%p191_p4, %s450_s12), 1 }
   0xf   : > { %s406_s18 = sshll.u32 %s530_s12, 3 }
  0x10   : > { %s198_s21 = scalar_lea.vmem %s521_s0, %s406_s18  ;;  %s208_s26 = scalar_lea.vmem %s524_s3, %s406_s18 }
  0x11   : > { %v212_v3 = vld [vmem:[%s198_s21] sm:$0xff] }
  0x12   : > { %v219_v4 = vcombine.high %v212_v3, %v212_v3 }
  0x14   : > { %401 = vmatprep.subr.msk.mxu0 %vm224_vm0, %v219_v4 }
  0x15   : > { %402 = vmatpush1.msk.msra.mxu0 %vm224_vm0, %v212_v3 }
  0x16   : > { %403 = vmatmul.mubr.msk.f32.vlgmr.msra.gmra.mrb[0].mxu0 %vm220_vm1, %v210_v5 }
  0x87   : > { %v216_v6 = vpop.permute.xlu0 %215 }
  0xe9   : > { %v295_v7 = vpop.f32.mrb[0].mxu0 }
  0xea   : > { %v296_v8 = vadd.f32 %v295_v7, %v216_v6  ;;  %v297_v9 = vpop.f32.mrb[1].mxu0 }
  0xeb   : > { %v298_v10 = vadd.f32 %v297_v9, %v216_v6 }
  0xed   : > { %v302_v11 = vcombine.low %v296_v8, %v298_v10 }
  0xef   : > { %304 = vst [vmem:[%s208_s26] sm:$0x77] %v302_v11 }
  0xf0 PF: > { %s13_s14 = sadd.s32 1, %s458_s14   ;;  %s525_s12 = smov %s454_s13 }
  0xf1   : > { %p10_p5 = scmp.ge.s32.totalorder %s13_s14, 4   ;;  %s526_s13 = smov %s528_s15 }
  0xf3   :  { %12 = sbr.rel (!%p10_p5) target bundleno = 2 (0x2), region = 62 }

</bundles_post_ra>
